<compile_context>
chip_gen: v5e
topology: v5e:2x2
jax: 0.10.0
libtpu: 0.0.40
codegen_flags: <defaults>
</compile_context>

<pallas_src>
import functools

import numpy as np

import jax
import jax.numpy as jnp
from jax.experimental import pallas as pl
from jax.experimental.pallas import tpu as pltpu


def _round_up(x, m):
    return (x + m - 1) // m * m


def _pick_tile(n, target, step):
    """Largest multiple of `step`, <= target, that divides n (n % step == 0)."""
    t = min(target, n)
    t -= t % step
    while n % t:
        t -= step
    return t


# --------------------------------------------------------------------------
# Pallas kernel: tiled matmul + bias.   out = x @ w + b
#   (decoder, and the one-time layer-0 gate-table precompute)
# --------------------------------------------------------------------------
def _matmul_bias_kernel(x_ref, w_ref, b_ref, o_ref):
    o_ref[...] = (jnp.dot(x_ref[...], w_ref[...],
                          preferred_element_type=jnp.float32)
                  + b_ref[...]).astype(o_ref.dtype)


def matmul_bias(x, w, b, *, tm=512, tn=None, out_dtype=jnp.float32):
    """x: (M, Kx) float; w: (Kp, Np) bf16 pre-padded (Kp%128==0, Np%128==0,
    Kx<=Kp); b: (1, Np) f32 pre-padded.  Returns (M, Np) out_dtype."""
    M, Kx = x.shape
    Kp, Np = w.shape
    assert Kp % 128 == 0 and Np % 128 == 0 and Kx <= Kp
    if tn is None:
        tn = _pick_tile(Np, 1024, 128)
    assert Np % tn == 0

    Mp = _round_up(max(M, 8), 8)
    tm = min(tm, Mp)
    tm = _round_up(tm, 8)
    Mp = _round_up(Mp, tm)

    xp = x.astype(jnp.bfloat16)
    if Mp != M or Kp != Kx:
        xp = jnp.pad(xp, ((0, Mp - M), (0, Kp - Kx)))

    out = pl.pallas_call(
        _matmul_bias_kernel,
        out_shape=jax.ShapeDtypeStruct((Mp, Np), out_dtype),
        grid=(Mp // tm, Np // tn),
        in_specs=[
            pl.BlockSpec((tm, Kp), lambda i, j: (i, 0)),
            pl.BlockSpec((Kp, tn), lambda i, j: (0, j)),
            pl.BlockSpec((1, tn), lambda i, j: (0, j)),
        ],
        out_specs=pl.BlockSpec((tm, tn), lambda i, j: (i, j)),
        compiler_params=pltpu.CompilerParams(
            dimension_semantics=("parallel", "parallel"),
            vmem_limit_bytes=48 * 1024 * 1024),
    )(xp, w, b)
    return out[:M] if Mp != M else out


# --------------------------------------------------------------------------
# Pallas kernel: 2-layer LSTM recurrence, K timesteps per grid step.
#   gates0_ref : (K, Bp, 4*Hp) bf16  layer-0 input gates (x@Wih0^T + b0), hoisted
#   whh0/wih1/whh1 : (Hp, 4*Hp) bf16 (per-gate columns padded to 128 lanes)
#   b1         : (1, 4*Hp) f32
# Gate layout follows PyTorch: [i | f | g | o], each gate block padded to Hp
# lanes.  Padded h/c lanes stay exactly 0 because padded gate preactivations
# are 0 (tanh(0)=0 for g) AND padded weight rows are 0.
# --------------------------------------------------------------------------
def _lstm2_chunk_kernel(T, gates0_ref, h0_ref, c0_ref,
                        whh0_ref, wih1_ref, whh1_ref, b1_ref,
                        out_ref, hN_ref, cN_ref,
                        h_scr, c_scr):
    chunk = pl.program_id(0)
    last_chunk = pl.num_programs(0) - 1
    K, Bp, _ = gates0_ref.shape
    Hp = h_scr.shape[-1]
    # Global step T-1 always falls inside the last chunk (Tp - K < T <= Tp).
    k_last = (T - 1) % K

    @pl.when(chunk == 0)
    def _init():
        h_scr[...] = h0_ref[...]
        c_scr[...] = c0_ref[...]

    whh0 = whh0_ref[...]
    whh1 = whh1_ref[...]
    b1 = b1_ref[...]                                   # (1, 4Hp) f32

    def gate_split(g):
        # Lane-aligned (128-multiple) slices: no cross-lane shuffles.
        i = jax.nn.sigmoid(g[:, 0 * Hp:1 * Hp])
        f = jax.nn.sigmoid(g[:, 1 * Hp:2 * Hp])
        gc = jnp.tanh(g[:, 2 * Hp:3 * Hp])
        o = jax.nn.sigmoid(g[:, 3 * Hp:4 * Hp])
        return i, f, gc, o

    # ---------------- layer 0: recurrence over the chunk ----------------
    # (input projection already folded into gates0)
    h0v = h_scr[0]
    c0v = c_scr[0]
    h0_steps = []
    for k in range(K):                                 # statically unrolled
        g0 = (gates0_ref[k].astype(jnp.float32)
              + jnp.dot(h0v.astype(jnp.bfloat16), whh0,
                        preferred_element_type=jnp.float32))
        i0, f0, gc0, o0 = gate_split(g0)
        c0v = f0 * c0v + i0 * gc0
        h0v = o0 * jnp.tanh(c0v)
        h0_steps.append(h0v)
        if k == k_last:
            @pl.when(chunk == last_chunk)
            def _capture_l0(h=h0v, c=c0v):
                hN_ref[0] = h
                cN_ref[0] = c
    h_scr[0] = h0v
    c_scr[0] = c0v

    # ---- layer 1: batched input projection for the whole chunk (one big
    #      (K*Bp, Hp) @ (Hp, 4Hp) MXU matmul instead of K tiny M=Bp matmuls;
    #      inter-layer dropout is identity in eval mode) ----
    h0_chunk = jnp.concatenate(h0_steps, axis=0).astype(jnp.bfloat16)
    g1_in = (jnp.dot(h0_chunk, wih1_ref[...],
                     preferred_element_type=jnp.float32)
             + b1)                                     # (K*Bp, 4Hp) f32

    # ---------------- layer 1: recurrence over the chunk ----------------
    h1v = h_scr[1]
    c1v = c_scr[1]
    h1_steps = []
    for k in range(K):
        g1 = (g1_in[k * Bp:(k + 1) * Bp, :]
              + jnp.dot(h1v.astype(jnp.bfloat16), whh1,
                        preferred_element_type=jnp.float32))
        i1, f1, gc1, o1 = gate_split(g1)
        c1v = f1 * c1v + i1 * gc1
        h1v = o1 * jnp.tanh(c1v)
        h1_steps.append(h1v)
        if k == k_last:
            @pl.when(chunk == last_chunk)
            def _capture_l1(h=h1v, c=c1v):
                hN_ref[1] = h
                cN_ref[1] = c
    h_scr[1] = h1v
    c_scr[1] = c1v

    # Single dense bf16 store of the whole output chunk (lane/sublane dense).
    out_ref[...] = jnp.stack(h1_steps, axis=0).astype(out_ref.dtype)


def lstm2_forward(gates0, h0p, c0p, prep, *, T, K):
    """gates0: (Tp, Bp, 4*Hp) bf16; h0p/c0p: (2, Bp, Hp) f32 (padded)."""
    Tp, Bp, G = gates0.shape
    Hp = prep["Hp"]
    assert G == 4 * Hp and Tp % K == 0

    const3 = lambda c: (0, 0, 0)
    const2 = lambda c: (0, 0)

    return pl.pallas_call(
        functools.partial(_lstm2_chunk_kernel, T),
        out_shape=(
            jax.ShapeDtypeStruct((Tp, Bp, Hp), jnp.bfloat16),   # h1 for all steps
            jax.ShapeDtypeStruct((2, Bp, Hp), jnp.float32),     # final h
            jax.ShapeDtypeStruct((2, Bp, Hp), jnp.float32),     # final c
        ),
        grid=(Tp // K,),
        in_specs=[
            pl.BlockSpec((K, Bp, 4 * Hp), lambda c: (c, 0, 0)),  # gates0 chunk
            pl.BlockSpec((2, Bp, Hp), const3),                   # h0
            pl.BlockSpec((2, Bp, Hp), const3),                   # c0
            pl.BlockSpec((Hp, 4 * Hp), const2),                  # W_hh l0 (bf16)
            pl.BlockSpec((Hp, 4 * Hp), const2),                  # W_ih l1 (bf16)
            pl.BlockSpec((Hp, 4 * Hp), const2),                  # W_hh l1 (bf16)
            pl.BlockSpec((1, 4 * Hp), const2),                   # b1 (f32)
        ],
        out_specs=(
            pl.BlockSpec((K, Bp, Hp), lambda c: (c, 0, 0)),      # output chunk
            pl.BlockSpec((2, Bp, Hp), const3),                   # final h
            pl.BlockSpec((2, Bp, Hp), const3),                   # final c
        ),
        scratch_shapes=[
            pltpu.VMEM((2, Bp, Hp), jnp.float32),                # h carry
            pltpu.VMEM((2, Bp, Hp), jnp.float32),                # c carry
        ],
        compiler_params=pltpu.CompilerParams(
            dimension_semantics=("arbitrary",),
            vmem_limit_bytes=48 * 1024 * 1024),
    )(gates0, h0p, c0p,
      prep["whh0"], prep["wih1"], prep["whh1"], prep["b1"])


# --------------------------------------------------------------------------
# Parameter preparation (PyTorch layout -> padded / fused / bf16 kernel layout)
# --------------------------------------------------------------------------
def init_raw_params(key, vocab_size, embed_size, hidden_size):
    """Random params in PyTorch layout / init distribution."""
    H, E, V = hidden_size, embed_size, vocab_size
    initrange = 0.1
    stdv = 1.0 / float(np.sqrt(H))
    ks = jax.random.split(key, 11)

    def u(k, shape, r):
        return jax.random.uniform(k, shape, jnp.float32, -r, r)

    return {
        "embedding": u(ks[0], (V, E), initrange),      # encoder.weight
        "weight_ih_l0": u(ks[1], (4 * H, E), stdv),
        "weight_hh_l0": u(ks[2], (4 * H, H), stdv),
        "bias_ih_l0": u(ks[3], (4 * H,), stdv),
        "bias_hh_l0": u(ks[4], (4 * H,), stdv),
        "weight_ih_l1": u(ks[5], (4 * H, H), stdv),
        "weight_hh_l1": u(ks[6], (4 * H, H), stdv),
        "bias_ih_l1": u(ks[7], (4 * H,), stdv),
        "bias_hh_l1": u(ks[8], (4 * H,), stdv),
        "dec_w": u(ks[9], (V, H), initrange),          # decoder.weight
        "dec_b": jnp.zeros((V,), jnp.float32),         # decoder.bias
    }


def prepare_params(raw, *, k_target=16):
    V, E = raw["embedding"].shape
    H = raw["weight_hh_l0"].shape[1]
    Hp = _round_up(H, 128)   # pad hidden (and each gate block) to 128 lanes
    Ep = _round_up(E, 128)

    def pad_gate_cols(w_t, rows):  # (in, 4H) -> (rows, 4Hp), per-gate lane padding
        out = jnp.zeros((rows, 4 * Hp), jnp.float32)
        for g in range(4):
            out = out.at[:w_t.shape[0], g * Hp:g * Hp + H].set(
                w_t[:, g * H:(g + 1) * H])
        return out

    def pad_gate_bias(b):          # (4H,) -> (1, 4Hp)
        out = jnp.zeros((1, 4 * Hp), jnp.float32)
        for g in range(4):
            out = out.at[0, g * Hp:g * Hp + H].set(b[g * H:(g + 1) * H])
        return out

    # Layer-0 input projection baked into a per-token gate table (bf16):
    #   gate_table0[v] = embedding[v] @ W_ih0^T + b_ih0 + b_hh0     (V, 4Hp)
    wih0_p = pad_gate_cols(raw["weight_ih_l0"].T, Ep).astype(jnp.bfloat16)
    b0_p = pad_gate_bias(raw["bias_ih_l0"] + raw["bias_hh_l0"])
    gate_table0 = matmul_bias(raw["embedding"], wih0_p, b0_p,
                              out_dtype=jnp.bfloat16)            # (V, 4Hp) bf16

    def pad_hidden_weight(w_torch):  # (4H, H) -> (Hp, 4Hp), zero pad rows/cols
        return pad_gate_cols(w_torch.T, Hp).astype(jnp.bfloat16)

    # Decoder weight: pre-transposed, row-padded to Hp, vocab padded so the
    # decoder tile tn_dec divides it (no forward-time padding of the big
    # weight), bf16; bias pre-padded f32.
    Vp128 = _round_up(V, 128)
    tn_dec = min(1024, Vp128)
    Vp = _round_up(Vp128, tn_dec)
    dec_w_t = (jnp.zeros((Hp, Vp), jnp.float32)
               .at[:H, :V].set(raw["dec_w"].T).astype(jnp.bfloat16))
    dec_b = jnp.zeros((1, Vp), jnp.float32).at[0, :V].set(raw["dec_b"])

    return {
        "V": V, "H": H, "Hp": Hp, "Vp": Vp, "tn_dec": tn_dec,
        "k_target": k_target,
        "gate_table0": gate_table0,
        "whh0": pad_hidden_weight(raw["weight_hh_l0"]),
        "wih1": pad_hidden_weight(raw["weight_ih_l1"]),
        "whh1": pad_hidden_weight(raw["weight_hh_l1"]),
        "b1": pad_gate_bias(raw["bias_ih_l1"] + raw["bias_hh_l1"]),  # (1, 4Hp)
        "dec_w_t": dec_w_t,
        "dec_b": dec_b,
    }


# --------------------------------------------------------------------------
# Full RNNModel forward (eval mode: dropout = identity)
# --------------------------------------------------------------------------
def rnn_model_forward(prep, input_ids, hidden):
    """input_ids: (T, B) int32; hidden = (h0, c0) each (2, B, H)."""
    h0, c0 = hidden
    T, B = input_ids.shape
    H, Hp, V = prep["H"], prep["Hp"], prep["V"]
    Bp = _round_up(max(B, 8), 8)

    # Pad T up to a multiple of K (tail steps computed and discarded); final
    # state is captured at step T-1 inside the kernel.
    K = min(prep["k_target"], T)
    Tp = _round_up(T, K)

    # Embedding gather directly returns layer-0 gates (projection pre-baked),
    # in bf16 to halve HBM traffic of the largest intermediate.
    ids_p = jnp.pad(input_ids, ((0, Tp - T), (0, Bp - B)))
    gates0 = jnp.take(prep["gate_table0"], ids_p, axis=0)      # (Tp, Bp, 4Hp) bf16

    # Invariant: padded hidden lanes / batch rows start at exactly 0 and padded
    # weight rows/cols are 0, so padded lanes stay 0 through the recurrence.
    h0p = jnp.pad(h0, ((0, 0), (0, Bp - B), (0, Hp - H)))
    c0p = jnp.pad(c0, ((0, 0), (0, Bp - B), (0, Hp - H)))

    out_p, hN_p, cN_p = lstm2_forward(gates0, h0p, c0p, prep, T=T, K=K)

    # Decode all Bp padded batch rows (avoids materializing a strided batch
    # slice of the hidden states); slice the logits once at the end.
    x = out_p[:T].reshape(T * Bp, Hp)                          # bf16, lane-dense
    logits = matmul_bias(x, prep["dec_w_t"], prep["dec_b"],
                         tm=512, tn=prep["tn_dec"])            # (T*Bp, Vp) f32
    decoded = logits.reshape(T, Bp, -1)[:, :B, :V]

    hN = hN_p[:, :B, :H]
    cN = cN_p[:, :B, :H]
    return decoded, (hN, cN)


# --------------------------------------------------------------------------
# Pure-JAX reference (f32) for a numeric sanity check
# --------------------------------------------------------------------------
def reference_forward(raw, input_ids, hidden):
    h0, c0 = hidden
    emb = raw["embedding"][input_ids]        # (T, B, E)
    T, B, _ = emb.shape
    H = raw["weight_hh_l0"].shape[1]

    def cell(x, h, c, w_ih, w_hh, b_ih, b_hh):
        gates = x @ w_ih.T + b_ih + h @ w_hh.T + b_hh
        i = jax.nn.sigmoid(gates[:, 0:H])
        f = jax.nn.sigmoid(gates[:, H:2 * H])
        g = jnp.tanh(gates[:, 2 * H:3 * H])
        o = jax.nn.sigmoid(gates[:, 3 * H:4 * H])
        c = f * c + i * g
        return o * jnp.tanh(c), c

    h_l, c_l = [h0[0], h0[1]], [c0[0], c0[1]]
    outs = []
    for t in range(T):
        h_l[0], c_l[0] = cell(emb[t], h_l[0], c_l[0],
                              raw["weight_ih_l0"], raw["weight_hh_l0"],
                              raw["bias_ih_l0"], raw["bias_hh_l0"])
        h_l[1], c_l[1] = cell(h_l[0], h_l[1], c_l[1],
                              raw["weight_ih_l1"], raw["weight_hh_l1"],
                              raw["bias_ih_l1"], raw["bias_hh_l1"])
        outs.append(h_l[1])
    out = jnp.stack(outs)                                   # (T, B, H)
    decoded = out.reshape(T * B, H) @ raw["dec_w"].T + raw["dec_b"]
    return decoded.reshape(T, B, -1), (jnp.stack(h_l), jnp.stack(c_l))


if __name__ == "__main__":
    VOCAB_SIZE = 64
    EMBED_SIZE = 32
    HIDDEN_SIZE = 32
    NLAYERS = 2
    SEQ_LEN = 8
    BATCH = 2

    key = jax.random.PRNGKey(0)
    k_params, k_input = jax.random.split(key)

    raw = init_raw_params(k_params, VOCAB_SIZE, EMBED_SIZE, HIDDEN_SIZE)
    prep = prepare_params(raw)   # runs the Pallas gate-table precompute once

    input_ids = jax.random.randint(k_input, (SEQ_LEN, BATCH), 0, VOCAB_SIZE,
                                   dtype=jnp.int32)
    # init_hidden(bsz): zeros (nlayers, bsz, hidden) for h and c
    h0 = jnp.zeros((NLAYERS, BATCH, HIDDEN_SIZE), jnp.float32)
    c0 = jnp.zeros((NLAYERS, BATCH, HIDDEN_SIZE), jnp.float32)

    fwd = jax.jit(functools.partial(rnn_model_forward, prep))
    decoded, (hN, cN) = fwd(input_ids, (h0, c0))
    jax.block_until_ready((decoded, hN, cN))

    assert decoded.shape == (SEQ_LEN, BATCH, VOCAB_SIZE)
    assert hN.shape == (NLAYERS, BATCH, HIDDEN_SIZE)
    assert cN.shape == (NLAYERS, BATCH, HIDDEN_SIZE)

    # Numeric sanity check vs pure-JAX f32 reference (loose tol: bf16 path).
    ref_dec, (ref_h, ref_c) = reference_forward(raw, input_ids, (h0, c0))
    np.testing.assert_allclose(np.asarray(decoded), np.asarray(ref_dec),
                               atol=3e-2, rtol=3e-2)
    np.testing.assert_allclose(np.asarray(hN), np.asarray(ref_h),
                               atol=3e-2, rtol=3e-2)
    np.testing.assert_allclose(np.asarray(cN), np.asarray(ref_c),
                               atol=3e-2, rtol=3e-2)

    print("KERNEL_OK")
</pallas_src>

<mosaic_0001>
module attributes {stable_mosaic.version = 11 : i64} {
  func.func @_matmul_bias_kernel(%arg0: i32, %arg1: i32, %arg2: memref<64x128xbf16, #tpu.memory_space<vmem>>, %arg3: memref<128x512xbf16, #tpu.memory_space<vmem>>, %arg4: memref<1x512xf32, #tpu.memory_space<vmem>>, %arg5: memref<64x512xbf16, #tpu.memory_space<vmem>>) attributes {dimension_semantics = [#tpu.dimension_semantics<parallel>, #tpu.dimension_semantics<parallel>], iteration_bounds = array<i64: 1, 1>, scalar_prefetch = 0 : i64, scratch_operands = 0 : i64, tpu.core_type = #tpu.core_type<tc>, window_params = [{transform_indices = @transform_0, window_bounds = array<i64: 64, 128>}, {transform_indices = @transform_1, window_bounds = array<i64: 128, 512>}, {transform_indices = @transform_2, window_bounds = array<i64: 1, 512>}, {transform_indices = @transform_3, window_bounds = array<i64: 64, 512>}]} {
    %c0 = arith.constant 0 : index
    %c0_0 = arith.constant 0 : index
    %0 = vector.load %arg2[%c0, %c0_0] : memref<64x128xbf16, #tpu.memory_space<vmem>>, vector<64x128xbf16>
    %c0_1 = arith.constant 0 : index
    %c0_2 = arith.constant 0 : index
    %1 = vector.load %arg3[%c0_1, %c0_2] : memref<128x512xbf16, #tpu.memory_space<vmem>>, vector<128x512xbf16>
    %cst = arith.constant dense<0.000000e+00> : vector<64x512xf32>
    %2 = tpu.matmul %0, %1, %cst {dimension_numbers = #tpu.dot_dimension_numbers<[1], [0], [0], [1], [0, 0, 1, 1], [], []>} : vector<64x128xbf16>, vector<128x512xbf16>, vector<64x512xf32> -> vector<64x512xf32>
    %c0_3 = arith.constant 0 : index
    %c0_4 = arith.constant 0 : index
    %3 = vector.load %arg4[%c0_3, %c0_4] : memref<1x512xf32, #tpu.memory_space<vmem>>, vector<1x512xf32>
    %4 = vector.broadcast %3 : vector<1x512xf32> to vector<64x512xf32>
    %5 = arith.addf %2, %4 : vector<64x512xf32>
    %6 = arith.truncf %5 : vector<64x512xf32> to vector<64x512xbf16>
    %c0_5 = arith.constant 0 : index
    %c0_6 = arith.constant 0 : index
    %7 = vector.load %arg5[%c0_5, %c0_6] : memref<64x512xbf16, #tpu.memory_space<vmem>>, vector<64x512xbf16>
    tpu.vector_store %arg5[%c0_5, %c0_6], %6 {strides = array<i32>} : memref<64x512xbf16, #tpu.memory_space<vmem>>, vector<64x512xbf16>,
    return
  }
  func.func @transform_0(%arg0: i32, %arg1: i32) -> (i32, i32) {
    %c0_i32 = arith.constant 0 : i32
    %c0_i32_0 = arith.constant 0 : i32
    return %arg0, %c0_i32 : i32, i32
  }
  func.func @transform_1(%arg0: i32, %arg1: i32) -> (i32, i32) {
    %c0_i32 = arith.constant 0 : i32
    %c0_i32_0 = arith.constant 0 : i32
    return %c0_i32, %arg1 : i32, i32
  }
  func.func @transform_2(%arg0: i32, %arg1: i32) -> (i32, i32) {
    %c0_i32 = arith.constant 0 : i32
    %c0_i32_0 = arith.constant 0 : i32
    return %c0_i32, %arg1 : i32, i32
  }
  func.func @transform_3(%arg0: i32, %arg1: i32) -> (i32, i32) {
    %c0_i32 = arith.constant 0 : i32
    return %arg0, %arg1 : i32, i32
  }
}

</mosaic_0001>

<bundles_post_ra>
// kernel: tpu_custom_call.1
= control target key start
LH: loop header
LB: loop body
LE: loop exit
PB: predicated region body
PF: predicated region fallthrough
CT: control target
= control target key end

     0   :  { %8 = vsyncpa [#allocation3], 0  ;;  %s838_s0 = inlined_call_operand.hbm [shape: bf16[64,128], index: 0, kind: input, shape index: {}]   ;;  %s839_s1 = inlined_call_operand.hbm [shape: bf16[128,512], index: 1, kind: input, shape index: {}]   ;;  %s840_s2 = inlined_call_operand.hbm [shape: f32[1,512], index: 2, kind: input, shape index: {}]   ;;  %s841_s3 = inlined_call_operand.hbm [shape: bf16[64,512], index: 3, kind: output, shape index: {}]  }
   0x1   :  { %9 = vsyncpa [#allocation6], 0  ;;  %s28_s14 = sshll.u32 %s839_s1, 4  ;;  %s29_s14 = int_to_ptr.hbm [resolvable:$true] %s28_s14 }
   0x2   :  { %10 = vsyncpa [#allocation4], 0  ;;  %s752_s15 = smov [#allocation5]   ;;  %s15_s19 = sshll.u32 %s838_s0, 4  ;;  %s16_s19 = int_to_ptr.hbm [resolvable:$true] %s15_s19 }
   0x3   :  { %s30_s16 = sshll.u32 %s752_s15, 4  ;;  %s753_s20 = smov 256   ;;  %s31_s16 = int_to_ptr.vmem [resolvable:$true] %s30_s16 }
   0x4   :  { %s754_s21 = smov 16   ;;  %s755_s22 = smov [#allocation2]  }
   0x5   :  { %36 = dma.hbm_to_vmem [thread:$0]  %s29_s14, 4096, %s31_s16, [#allocation6], %s753_s20, %s753_s20, %s754_s21  }
   0x6   :  { %s17_s23 = sshll.u32 %s755_s22, 4  ;;  %s756_s1 = smov 64   ;;  %s18_s23 = int_to_ptr.vmem [resolvable:$true] %s17_s23 }
   0x7   :  { %s757_s24 = smov 4   ;;  %s42_s27 = sshll.u32 %s840_s2, 4  ;;  %s43_s27 = int_to_ptr.hbm [resolvable:$true] %s42_s27 }
   0x8   :  { %23 = dma.hbm_to_vmem [thread:$0]  %s16_s19, 512, %s18_s23, [#allocation3], %s756_s1, %s756_s1, %s757_s24  }
   0x9   :  { %s758_s28 = smov [#allocation7]  }
   0xa   :  { %s44_s0 = sshll.u32 %s758_s28, 4  ;;  %s45_s0 = int_to_ptr.vmem [resolvable:$true] %s44_s0 }
   0xb   :  { %47 = dma.hbm_to_vmem [thread:$0]  %s43_s27, 64, %s45_s0, [#allocation6]  }
   0xc   :  { %746 = dma.done.wait [#allocation3], 512  }
   0xd   :  { %747 = vsyncadd [#allocation3], 4294966784 }
   0xe   :  { %748 = dma.done.wait [#allocation6], 4160  }
   0xf   :  { %749 = vsyncadd [#allocation6], 4294963136  ;;  %v592_v0 = vld [vmem:[#allocation5 + $0xe0] sm:$0xf]  ;;  %v640_v1 = vld [vmem:[#allocation5 + $0xec] sm:$0xf0] }
  0x10   :  { %v638_v2 = vld [vmem:[#allocation5 + $0xe4] sm:$0xf]  ;;  %v593_v3 = vor.u32 %v640_v1, %v592_v0  ;;  %v594_v4 = vld [vmem:[#allocation5 + $0xf0] sm:$0xf0]  ;;  %v600_v5 = vld [vmem:[#allocation5 + $0xe8] sm:$0xf] }
  0x11   :  { %v641_v6 = vld [vmem:[#allocation5 + $0xf4] sm:$0xf0]  ;;  %v597_v7 = vor.u32 %v638_v2, %v594_v4  ;;  %v639_v9 = vld [vmem:[#allocation5 + $0xec] sm:$0xf]  ;;  %v602_v10 = vld [vmem:[#allocation5 + $0xf8] sm:$0xf0] }
  0x12   :  { %v601_v8 = vor.u32 %v641_v6, %v600_v5  ;;  %v576_v11 = vld [vmem:[#allocation5 + $0xc0] sm:$0xf]  ;;  %294 = vmatpush.bf16.msra.mxu0 %v593_v3  ;;  %v605_v12 = vor.u32 %v639_v9, %v602_v10  ;;  %v636_v13 = vld [vmem:[#allocation5 + $0xcc] sm:$0xf0]  ;;  %v634_v14 = vld [vmem:[#allocation5 + $0xc4] sm:$0xf] }
  0x13   :  { %v578_v15 = vld [vmem:[#allocation5 + $0xd0] sm:$0xf0]  ;;  %323 = vmatpush.bf16.msra.mxu1 %v597_v7  ;;  %v577_v16 = vor.u32 %v636_v13, %v576_v11  ;;  %v584_v18 = vld [vmem:[#allocation5 + $0xc8] sm:$0xf]  ;;  %v637_v19 = vld [vmem:[#allocation5 + $0xd4] sm:$0xf0] }
  0x14   :  { %352 = vmatpush.bf16.msra.mxu2 %v601_v8  ;;  %v581_v17 = vor.u32 %v634_v14, %v578_v15  ;;  %v635_v20 = vld [vmem:[#allocation5 + $0xcc] sm:$0xf]  ;;  %381 = vmatpush.bf16.msra.mxu3 %v605_v12  ;;  %v585_v21 = vor.u32 %v637_v19, %v584_v18  ;;  %v586_v22 = vld [vmem:[#allocation5 + $0xd8] sm:$0xf0]  ;;  %v560_v23 = vld [vmem:[#allocation5 + $0xa0] sm:$0xf] }
  0x15   :  { %v632_v24 = vld [vmem:[#allocation5 + $0xac] sm:$0xf0]  ;;  %v589_v25 = vor.u32 %v635_v20, %v586_v22  ;;  %v630_v26 = vld [vmem:[#allocation5 + $0xa4] sm:$0xf]  ;;  %v562_v27 = vld [vmem:[#allocation5 + $0xb0] sm:$0xf0] }
  0x16   :  { %v568_v28 = vld [vmem:[#allocation5 + $0xa8] sm:$0xf]  ;;  %295 = vmatpush.bf16.msra.mxu0 %v577_v16  ;;  %v561_v29 = vor.u32 %v632_v24, %v560_v23  ;;  %v633_v30 = vld [vmem:[#allocation5 + $0xb4] sm:$0xf0]  ;;  %v631_v31 = vld [vmem:[#allocation5 + $0xac] sm:$0xf]  ;;  %v565_v33 = vor.u32 %v630_v26, %v562_v27 }
  0x17   :  { %v570_v32 = vld [vmem:[#allocation5 + $0xb8] sm:$0xf0]  ;;  %324 = vmatpush.bf16.msra.mxu1 %v581_v17  ;;  %v569_v34 = vor.u32 %v633_v30, %v568_v28  ;;  %v544_v35 = vld [vmem:[#allocation5 + $0x80] sm:$0xf]  ;;  %v628_v36 = vld [vmem:[#allocation5 + $0x8c] sm:$0xf0] }
  0x18   :  { %353 = vmatpush.bf16.msra.mxu2 %v585_v21  ;;  %v626_v37 = vld [vmem:[#allocation5 + $0x84] sm:$0xf]  ;;  %382 = vmatpush.bf16.msra.mxu3 %v589_v25  ;;  %v573_v38 = vor.u32 %v631_v31, %v570_v32  ;;  %v546_v39 = vld [vmem:[#allocation5 + $0x90] sm:$0xf0]  ;;  %v552_v40 = vld [vmem:[#allocation5 + $0x88] sm:$0xf]  ;;  %v545_v44 = vor.u32 %v628_v36, %v544_v35 }
  0x19   :  { %v629_v41 = vld [vmem:[#allocation5 + $0x94] sm:$0xf0]  ;;  %v627_v42 = vld [vmem:[#allocation5 + $0x8c] sm:$0xf]  ;;  %v554_v43 = vld [vmem:[#allocation5 + $0x98] sm:$0xf0]  ;;  %v549_v45 = vor.u32 %v626_v37, %v546_v39 }
  0x1a   :  { %296 = vmatpush.bf16.msra.mxu0 %v561_v29  ;;  %v553_v46 = vor.u32 %v629_v41, %v552_v40  ;;  %v528_v47 = vld [vmem:[#allocation5 + $0x60] sm:$0xf]  ;;  %v624_v48 = vld [vmem:[#allocation5 + $0x6c] sm:$0xf0]  ;;  %v622_v49 = vld [vmem:[#allocation5 + $0x64] sm:$0xf]  ;;  %v557_v50 = vor.u32 %v627_v42, %v554_v43 }
  0x1b   :  { %325 = vmatpush.bf16.msra.mxu1 %v565_v33  ;;  %v530_v51 = vld [vmem:[#allocation5 + $0x70] sm:$0xf0]  ;;  %v536_v52 = vld [vmem:[#allocation5 + $0x68] sm:$0xf]  ;;  %v625_v53 = vld [vmem:[#allocation5 + $0x74] sm:$0xf0]  ;;  %v529_v56 = vor.u32 %v624_v48, %v528_v47 }
  0x1c   :  { %354 = vmatpush.bf16.msra.mxu2 %v569_v34  ;;  %383 = vmatpush.bf16.msra.mxu3 %v573_v38  ;;  %v623_v54 = vld [vmem:[#allocation5 + $0x6c] sm:$0xf]  ;;  %v538_v55 = vld [vmem:[#allocation5 + $0x78] sm:$0xf0]  ;;  %v533_v57 = vor.u32 %v622_v49, %v530_v51  ;;  %v537_v58 = vor.u32 %v625_v53, %v536_v52  ;;  %v512_v59 = vld [vmem:[#allocation5 + $0x40] sm:$0xf] }
  0x1d   :  { %v620_v60 = vld [vmem:[#allocation5 + $0x4c] sm:$0xf0]  ;;  %v618_v61 = vld [vmem:[#allocation5 + $0x44] sm:$0xf]  ;;  %v541_v62 = vor.u32 %v623_v54, %v538_v55  ;;  %v514_v63 = vld [vmem:[#allocation5 + $0x50] sm:$0xf0] }
  0x1e   :  { %297 = vmatpush.bf16.msra.mxu0 %v545_v44  ;;  %v520_v0 = vld [vmem:[#allocation5 + $0x48] sm:$0xf]  ;;  %v621_v1 = vld [vmem:[#allocation5 + $0x54] sm:$0xf0]  ;;  %v619_v2 = vld [vmem:[#allocation5 + $0x4c] sm:$0xf]  ;;  %v513_v4 = vor.u32 %v620_v60, %v512_v59  ;;  %v517_v5 = vor.u32 %v618_v61, %v514_v63 }
  0x1f   :  { %326 = vmatpush.bf16.msra.mxu1 %v549_v45  ;;  %v522_v3 = vld [vmem:[#allocation5 + $0x58] sm:$0xf0]  ;;  %v521_v6 = vor.u32 %v621_v1, %v520_v0  ;;  %v496_v7 = vld [vmem:[#allocation5 + $0x20] sm:$0xf]  ;;  %v616_v8 = vld [vmem:[#allocation5 + $0x2c] sm:$0xf0] }
  0x20   :  { %355 = vmatpush.bf16.msra.mxu2 %v553_v46  ;;  %384 = vmatpush.bf16.msra.mxu3 %v557_v50  ;;  %v614_v9 = vld [vmem:[#allocation5 + $0x24] sm:$0xf]  ;;  %v525_v10 = vor.u32 %v619_v2, %v522_v3  ;;  %v498_v11 = vld [vmem:[#allocation5 + $0x30] sm:$0xf0]  ;;  %v504_v12 = vld [vmem:[#allocation5 + $0x28] sm:$0xf]  ;;  %v497_v16 = vor.u32 %v616_v8, %v496_v7 }
  0x21   :  { %v617_v13 = vld [vmem:[#allocation5 + $0x34] sm:$0xf0]  ;;  %v615_v14 = vld [vmem:[#allocation5 + $0x2c] sm:$0xf]  ;;  %v506_v15 = vld [vmem:[#allocation5 + $0x38] sm:$0xf0]  ;;  %v501_v17 = vor.u32 %v614_v9, %v498_v11 }
  0x22   :  { %298 = vmatpush.bf16.msra.mxu0 %v529_v56  ;;  %v505_v18 = vor.u32 %v617_v13, %v504_v12  ;;  %v480_v19 = vld [vmem:[#allocation5] sm:$0xf]  ;;  %v612_v20 = vld [vmem:[#allocation5 + $0xc] sm:$0xf0]  ;;  %v610_v21 = vld [vmem:[#allocation5 + $0x4] sm:$0xf]  ;;  %v509_v22 = vor.u32 %v615_v14, %v506_v15 }
  0x23   :  { %327 = vmatpush.bf16.msra.mxu1 %v533_v57  ;;  %v482_v23 = vld [vmem:[#allocation5 + $0x10] sm:$0xf0]  ;;  %v488_v24 = vld [vmem:[#allocation5 + $0x8] sm:$0xf]  ;;  %v613_v25 = vld [vmem:[#allocation5 + $0x14] sm:$0xf0]  ;;  %v481_v28 = vor.u32 %v612_v20, %v480_v19 }
  0x24   :  { %356 = vmatpush.bf16.msra.mxu2 %v537_v58  ;;  %385 = vmatpush.bf16.msra.mxu3 %v541_v62  ;;  %v611_v26 = vld [vmem:[#allocation5 + $0xc] sm:$0xf]  ;;  %v490_v27 = vld [vmem:[#allocation5 + $0x18] sm:$0xf0]  ;;  %v485_v29 = vor.u32 %v610_v21, %v482_v23  ;;  %v489_v30 = vor.u32 %v613_v25, %v488_v24  ;;  %v606_v32 = vld [vmem:[#allocation2] sm:$0xff]  ;;  %s759_s2 = smov [#allocation8]  }
  0x25   :  { %v493_v31 = vor.u32 %v611_v26, %v490_v27  ;;  %v607_v33 = vld [vmem:[#allocation2 + $0x8] sm:$0xff]  ;;  %v608_v34 = vld [vmem:[#allocation2 + $0x10] sm:$0xff]  ;;  %v609_v35 = vld [vmem:[#allocation2 + $0x18] sm:$0xff]  ;;  %s446_s29 = sshll.u32 %s759_s2, 4  ;;  %s448_s5 = sshll.u32 %s841_s3, 4  ;;  %s447_s29 = int_to_ptr.vmem [resolvable:$true] %s446_s29  ;;  %s449_s5 = int_to_ptr.hbm [resolvable:$true] %s448_s5 }
  0x26   :  { %299 = vmatpush.bf16.msra.mxu0 %v513_v4  ;;  %v100_v36 = vld [vmem:[#allocation7] sm:$0xf] }
  0x27   :  { %328 = vmatpush.bf16.msra.mxu1 %v517_v5  ;;  %v792_v37 = vperm.slane %v100_v36, 0  ;;  %v794_v38 = vperm.slane %v100_v36, 1  ;;  %v798_v44 = vperm.slane %v100_v36, 2  ;;  %v800_v45 = vperm.slane %v100_v36, 3 }
  0x28   :  { %357 = vmatpush.bf16.msra.mxu2 %v521_v6  ;;  %386 = vmatpush.bf16.msra.mxu3 %v525_v10 }
  0x2a   :  { %300 = vmatpush.bf16.msra.mxu0 %v497_v16 }
  0x2b   :  { %329 = vmatpush.bf16.msra.mxu1 %v501_v17 }
  0x2c   :  { %358 = vmatpush.bf16.msra.mxu2 %v505_v18  ;;  %387 = vmatpush.bf16.msra.mxu3 %v509_v22 }
  0x2e   :  { %301 = vmatpush.bf16.msra.mxu0 %v481_v28 }
  0x2f   :  { %330 = vmatpush.bf16.msra.mxu1 %v485_v29 }
  0x30   :  { %359 = vmatpush.bf16.msra.mxu2 %v489_v30  ;;  %388 = vmatpush.bf16.msra.mxu3 %v493_v31 }
  0x31   :  { %302 = vmatmul.bf16.vlgmr.msra.gmra.mxu0 %v606_v32 }
  0x32   :  { %331 = vmatmul.bf16.vlgmr.msra.gmra.mxu1 %v606_v32 }
  0x33   :  { %360 = vmatmul.bf16.vlgmr.msra.gmra.mxu2 %v606_v32  ;;  %389 = vmatmul.bf16.vlgmr.msra.gmra.mxu3 %v606_v32 }
  0x41   :  { %307 = vmatmul.bf16.gmra.mxu0 %v607_v33 }
  0x42   :  { %336 = vmatmul.bf16.gmra.mxu1 %v607_v33 }
  0x43   :  { %365 = vmatmul.bf16.gmra.mxu2 %v607_v33  ;;  %394 = vmatmul.bf16.gmra.mxu3 %v607_v33 }
  0x51   :  { %312 = vmatmul.bf16.gmra.mxu0 %v608_v34 }
  0x52   :  { %341 = vmatmul.bf16.gmra.mxu1 %v608_v34 }
  0x53   :  { %370 = vmatmul.bf16.gmra.mxu2 %v608_v34  ;;  %399 = vmatmul.bf16.gmra.mxu3 %v608_v34 }
  0x61   :  { %317 = vmatmul.bf16.gmra.mxu0 %v609_v35 }
  0x62   :  { %346 = vmatmul.bf16.gmra.mxu1 %v609_v35 }
  0x63   :  { %375 = vmatmul.bf16.gmra.mxu2 %v609_v35  ;;  %404 = vmatmul.bf16.gmra.mxu3 %v609_v35 }
  0xae   :  { %v303_v39 = vpop.f32.mrf.mxu0 }
  0xaf   :  { %v304_v40 = vadd.f32 %v303_v39, %v792_v37  ;;  %v332_v41 = vpop.f32.mrf.mxu1 }
  0xb0   :  { %v333_v42 = vadd.f32 %v332_v41, %v794_v38 }
  0xb2   :  { %v410_v43 = vpack.c.bf16 %v333_v42, %v304_v40 }
  0xb4   :  { %426 = vst [vmem:[#allocation8] sm:$0xff] %v410_v43 }
  0xb6   :  { %v361_v46 = vpop.f32.mrf.mxu2  ;;  %v390_v48 = vpop.f32.mrf.mxu3 }
  0xb7   :  { %v362_v47 = vadd.f32 %v361_v46, %v798_v44  ;;  %v305_v49 = vpop.f32.mrf.mxu0  ;;  %v391_v50 = vadd.f32 %v390_v48, %v800_v45  ;;  %v334_v52 = vpop.f32.mrf.mxu1 }
  0xb8   :  { %v306_v51 = vadd.f32 %v305_v49, %v792_v37  ;;  %v335_v53 = vadd.f32 %v334_v52, %v794_v38 }
  0xb9   :  { %v411_v54 = vpack.c.bf16 %v391_v50, %v362_v47 }
  0xba   :  { %v412_v55 = vpack.c.bf16 %v335_v53, %v306_v51 }
  0xbb   :  { %427 = vst [vmem:[#allocation8 + $0x8] sm:$0xff] %v411_v54 }
  0xbc   :  { %428 = vst [vmem:[#allocation8 + $0x10] sm:$0xff] %v412_v55 }
  0xbe   :  { %v363_v56 = vpop.f32.mrf.mxu2  ;;  %v392_v58 = vpop.f32.mrf.mxu3 }
  0xbf   :  { %v364_v57 = vadd.f32 %v363_v56, %v798_v44  ;;  %v308_v59 = vpop.f32.mrf.mxu0  ;;  %v393_v60 = vadd.f32 %v392_v58, %v800_v45  ;;  %v337_v62 = vpop.f32.mrf.mxu1 }
  0xc0   :  { %v309_v61 = vadd.f32 %v308_v59, %v792_v37  ;;  %v338_v63 = vadd.f32 %v337_v62, %v794_v38 }
  0xc1   :  { %v413_v0 = vpack.c.bf16 %v393_v60, %v364_v57 }
  0xc2   :  { %v414_v1 = vpack.c.bf16 %v338_v63, %v309_v61 }
  0xc3   :  { %429 = vst [vmem:[#allocation8 + $0x18] sm:$0xff] %v413_v0 }
  0xc4   :  { %430 = vst [vmem:[#allocation8 + $0x20] sm:$0xff] %v414_v1 }
  0xc6   :  { %v366_v2 = vpop.f32.mrf.mxu2  ;;  %v395_v4 = vpop.f32.mrf.mxu3 }
  0xc7   :  { %v367_v3 = vadd.f32 %v366_v2, %v798_v44  ;;  %v310_v5 = vpop.f32.mrf.mxu0  ;;  %v396_v6 = vadd.f32 %v395_v4, %v800_v45  ;;  %v339_v8 = vpop.f32.mrf.mxu1 }
  0xc8   :  { %v311_v7 = vadd.f32 %v310_v5, %v792_v37  ;;  %v340_v9 = vadd.f32 %v339_v8, %v794_v38 }
  0xc9   :  { %v415_v10 = vpack.c.bf16 %v396_v6, %v367_v3 }
  0xca   :  { %v416_v11 = vpack.c.bf16 %v340_v9, %v311_v7 }
  0xcb   :  { %431 = vst [vmem:[#allocation8 + $0x28] sm:$0xff] %v415_v10 }
  0xcc   :  { %432 = vst [vmem:[#allocation8 + $0x30] sm:$0xff] %v416_v11 }
  0xce   :  { %v368_v12 = vpop.f32.mrf.mxu2  ;;  %v397_v14 = vpop.f32.mrf.mxu3 }
  0xcf   :  { %v369_v13 = vadd.f32 %v368_v12, %v798_v44  ;;  %v313_v15 = vpop.f32.mrf.mxu0  ;;  %v398_v16 = vadd.f32 %v397_v14, %v800_v45  ;;  %v342_v18 = vpop.f32.mrf.mxu1 }
  0xd0   :  { %v314_v17 = vadd.f32 %v313_v15, %v792_v37  ;;  %v343_v19 = vadd.f32 %v342_v18, %v794_v38 }
  0xd1   :  { %v417_v20 = vpack.c.bf16 %v398_v16, %v369_v13 }
  0xd2   :  { %v418_v21 = vpack.c.bf16 %v343_v19, %v314_v17 }
  0xd3   :  { %433 = vst [vmem:[#allocation8 + $0x38] sm:$0xff] %v417_v20 }
  0xd4   :  { %434 = vst [vmem:[#allocation8 + $0x40] sm:$0xff] %v418_v21 }
  0xd6   :  { %v371_v22 = vpop.f32.mrf.mxu2  ;;  %v400_v24 = vpop.f32.mrf.mxu3 }
  0xd7   :  { %v372_v23 = vadd.f32 %v371_v22, %v798_v44  ;;  %v315_v25 = vpop.f32.mrf.mxu0  ;;  %v401_v26 = vadd.f32 %v400_v24, %v800_v45  ;;  %v344_v28 = vpop.f32.mrf.mxu1 }
  0xd8   :  { %v316_v27 = vadd.f32 %v315_v25, %v792_v37  ;;  %v345_v29 = vadd.f32 %v344_v28, %v794_v38 }
  0xd9   :  { %v419_v30 = vpack.c.bf16 %v401_v26, %v372_v23 }
  0xda   :  { %v420_v31 = vpack.c.bf16 %v345_v29, %v316_v27 }
  0xdb   :  { %435 = vst [vmem:[#allocation8 + $0x48] sm:$0xff] %v419_v30 }
  0xdc   :  { %436 = vst [vmem:[#allocation8 + $0x50] sm:$0xff] %v420_v31 }
  0xde   :  { %v373_v32 = vpop.f32.mrf.mxu2  ;;  %v402_v34 = vpop.f32.mrf.mxu3 }
  0xdf   :  { %v374_v33 = vadd.f32 %v373_v32, %v798_v44  ;;  %v318_v35 = vpop.f32.mrf.mxu0  ;;  %v403_v36 = vadd.f32 %v402_v34, %v800_v45  ;;  %v347_v40 = vpop.f32.mrf.mxu1 }
  0xe0   :  { %v319_v39 = vadd.f32 %v318_v35, %v792_v37  ;;  %v348_v41 = vadd.f32 %v347_v40, %v794_v38 }
  0xe1   :  { %v421_v42 = vpack.c.bf16 %v403_v36, %v374_v33 }
  0xe2   :  { %v422_v43 = vpack.c.bf16 %v348_v41, %v319_v39 }
  0xe3   :  { %437 = vst [vmem:[#allocation8 + $0x58] sm:$0xff] %v421_v42 }
  0xe4   :  { %438 = vst [vmem:[#allocation8 + $0x60] sm:$0xff] %v422_v43 }
  0xe6   :  { %v376_v46 = vpop.f32.mrf.mxu2  ;;  %v405_v48 = vpop.f32.mrf.mxu3 }
  0xe7   :  { %v377_v47 = vadd.f32 %v376_v46, %v798_v44  ;;  %v320_v49 = vpop.f32.mrf.mxu0  ;;  %v406_v50 = vadd.f32 %v405_v48, %v800_v45  ;;  %v349_v52 = vpop.f32.mrf.mxu1 }
  0xe8   :  { %v321_v51 = vadd.f32 %v320_v49, %v792_v37  ;;  %v350_v53 = vadd.f32 %v349_v52, %v794_v38 }
  0xe9   :  { %v423_v54 = vpack.c.bf16 %v406_v50, %v377_v47 }
  0xea   :  { %v424_v55 = vpack.c.bf16 %v350_v53, %v321_v51 }
  0xeb   :  { %439 = vst [vmem:[#allocation8 + $0x68] sm:$0xff] %v423_v54 }
  0xec   :  { %440 = vst [vmem:[#allocation8 + $0x70] sm:$0xff] %v424_v55 }
  0xee   :  { %v378_v56 = vpop.f32.mrf.mxu2  ;;  %v407_v58 = vpop.f32.mrf.mxu3 }
  0xef   :  { %v379_v57 = vadd.f32 %v378_v56, %v798_v44  ;;  %v408_v59 = vadd.f32 %v407_v58, %v800_v45 }
  0xf1   :  { %v425_v37 = vpack.c.bf16 %v408_v59, %v379_v57 }
  0xf3   :  { %441 = vst [vmem:[#allocation8 + $0x78] sm:$0xff] %v425_v37 }
  0xf4   :  { %454 = dma.vmem_to_hbm [thread:$0]  %s447_s29, 2048, %s449_s5, [#allocation4], %s753_s20, %s753_s20, %s754_s21  }
  0xf5   :  { %750 = dma.done.wait [#allocation4], 2048  }
  0xf6   :  { %751 = vsyncadd [#allocation4], 4294965248 }
  0xf7   :  { %459 = vsyncpa [#allocation3], 1 }
  0xf8   :  { %460 = vsyncpa [#allocation6], 1 }
  0xf9   :  { %461 = vsyncpa [#allocation4], 1 }

</bundles_post_ra>
